<compile_context>
chip_gen: v6e
topology: v6e:2x2x1
jax: 0.10.0
libtpu: 0.0.40
codegen_flags: <defaults>
</compile_context>

<pallas_src>
import math
import functools

import jax
import jax.numpy as jnp
from jax.experimental import pallas as pl
from jax.experimental.pallas import tpu as pltpu


def _round_up(x, m):
    return ((x + m - 1) // m) * m


def _attention_kernel(n_head, hidden_dim, compute_dtype,
                      q_ref, kx_ref, kxt_ref,
                      wq_ref, bq_ref, wp_ref, bp_ref,
                      out_ref, score_ref):
    nh, H = n_head, hidden_dim
    B, TQ, E = q_ref.shape
    out_dim = wp_ref.shape[2]
    f32 = jnp.float32

    q2d = q_ref[...].reshape(B * TQ, E).astype(compute_dtype)

    # ---- per-head Q projection + scores against hoisted, pre-transposed kxt
    # (head-major weight/K slices are leading-axis slices -> no lane relayout,
    #  no in-kernel transposes, no concatenate).
    s_heads = []
    for h in range(nh):
        qx_h = (jnp.dot(q2d, wq_ref[h].astype(compute_dtype),
                        preferred_element_type=f32)
                + bq_ref[h]).reshape(B, TQ, H)                       # (B,TQ,H)
        s_h = jnp.einsum('bqh,bhk->bqk',
                         qx_h.astype(compute_dtype),
                         kxt_ref[h].astype(compute_dtype),
                         preferred_element_type=f32)                 # (B,TQ,Lk)
        s_heads.append(s_h)

    # ---- softmax over dim 0 of the (nh*B, TQ, Lk) score (head AND batch),
    # exactly mirroring `F.softmax(score, dim=0)` in the torch module.
    m = functools.reduce(jnp.maximum,
                         [s.max(axis=0, keepdims=True) for s in s_heads])
    e_heads = [jnp.exp(s - m) for s in s_heads]
    denom = functools.reduce(jnp.add,
                             [e.sum(axis=0, keepdims=True) for e in e_heads])
    inv = 1.0 / denom          # exact divide keeps the 1e-5 score tolerance

    # ---- context bmm + proj as K-split accumulation over heads
    # (dropout is identity at p=0 -> no-op)
    acc = jnp.zeros((B * TQ, out_dim), dtype=f32)
    for h in range(nh):
        soft_h = e_heads[h] * inv                                    # (B,TQ,Lk)
        score_ref[h] = soft_h                                        # leading-axis store
        ctx_h = jnp.einsum('bqk,bkh->bqh',
                           soft_h.astype(compute_dtype),
                           kx_ref[h].astype(compute_dtype),
                           preferred_element_type=f32)               # (B,TQ,H)
        acc = acc + jnp.dot(ctx_h.reshape(B * TQ, H).astype(compute_dtype),
                            wp_ref[h].astype(compute_dtype),
                            preferred_element_type=f32)              # (B*TQ,out)
    out_ref[...] = (acc + bp_ref[...]).reshape(B, TQ, out_dim)


def _choose_tile(Lq, Lk_pad, B, nh, H, E, out_dim):
    """Pick TQ from an explicit VMEM budget (conservative for v7x 64 MiB)."""
    item = 4
    resident = (2 * nh * B * Lk_pad * H            # kx + kxt (constant index_map)
                + nh * E * H + nh * H               # wq, bq
                + nh * H * out_dim + out_dim) * item
    def tile_bytes(tq):                             # double-buffered per-tile blocks
        per = (B * tq * E + B * tq * out_dim + nh * B * tq * Lk_pad) * item
        return 2 * per
    lq_cap = _round_up(min(Lq, 512), 8)
    budget = 40 * 1024 * 1024
    tq = 8
    for cand in (512, 256, 128, 64, 32, 16, 8):
        if cand > lq_cap:
            continue
        if resident + tile_bytes(cand) + (8 << 20) <= budget:
            tq = cand
            break
    # TODO(synk): if `resident` alone exceeds the budget (very large Lk), add a
    # second ("arbitrary") grid axis streaming kx over Lk with an out accumulator.
    vmem_limit = max(resident + tile_bytes(tq) + (16 << 20), 32 << 20)
    vmem_limit = min(vmem_limit, 48 << 20)
    return tq, int(vmem_limit)


def attention_forward(k, q, params, n_head, hidden_dim,
                      compute_dtype=jnp.float32):
    """Returns (output (B,q_len,out_dim), score (nh*B,q_len,k_len))."""
    wk, bk, wq, bq, wp, bp = params
    if q.ndim == 2:
        q = q[:, None, :]
    if k.ndim == 2:
        k = k[:, None, :]
    B, Lk, E = k.shape
    Lq = q.shape[1]
    out_dim = wp.shape[1]
    nh, H = n_head, hidden_dim

    # ---- hoisted K projection (q-tile independent), head-major, lane-padded ----
    Lk_pad = _round_up(max(Lk, 128), 128)
    kx = (k.reshape(B * Lk, E) @ wk + bk).reshape(B, Lk, nh, H)
    kx = jnp.transpose(kx, (2, 0, 1, 3))                     # (nh, B, Lk, H)
    if Lk_pad != Lk:
        # zero rows -> padded keys contribute exactly 0 to the context bmm
        kx = jnp.pad(kx, ((0, 0), (0, 0), (0, Lk_pad - Lk), (0, 0)))
    kxt = jnp.transpose(kx, (0, 1, 3, 2))                    # (nh, B, H, Lk_pad)

    # head-major weight views (computed once, outside the kernel)
    wq_hm = jnp.transpose(wq.reshape(E, nh, H), (1, 0, 2))   # (nh, E, H)
    bq_hm = bq.reshape(nh, 1, H)                             # (nh, 1, H)
    wp_hm = wp.reshape(nh, H, out_dim)                       # (nh, H, out)

    TQ, vmem_limit = _choose_tile(Lq, Lk_pad, B, nh, H, E, out_dim)
    Lq_pad = _round_up(Lq, TQ)
    qp = jnp.pad(q, ((0, 0), (0, Lq_pad - Lq), (0, 0))) if Lq_pad != Lq else q
    grid = (Lq_pad // TQ,)

    flops = (2 * B * Lq_pad * E * nh * H
             + 4 * nh * B * Lq_pad * Lk_pad * H
             + 2 * B * Lq_pad * nh * H * out_dim)
    bytes_accessed = 4 * (qp.size + kx.size + kxt.size + wq_hm.size
                          + bq_hm.size + wp_hm.size + bp.size
                          + B * Lq_pad * out_dim + nh * B * Lq_pad * Lk_pad)

    kernel = functools.partial(_attention_kernel, nh, H, compute_dtype)

    out, score4 = pl.pallas_call(
        kernel,
        grid=grid,
        in_specs=[
            pl.BlockSpec((B, TQ, E), lambda qi: (0, qi, 0)),            # q (q-tiled)
            pl.BlockSpec((nh, B, Lk_pad, H), lambda qi: (0, 0, 0, 0)),  # kx (resident)
            pl.BlockSpec((nh, B, H, Lk_pad), lambda qi: (0, 0, 0, 0)),  # kxt (resident)
            pl.BlockSpec((nh, E, H), lambda qi: (0, 0, 0)),             # wq head-major
            pl.BlockSpec((nh, 1, H), lambda qi: (0, 0, 0)),             # bq head-major
            pl.BlockSpec((nh, H, out_dim), lambda qi: (0, 0, 0)),       # wp head-major
            pl.BlockSpec((1, out_dim), lambda qi: (0, 0)),              # bp
        ],
        out_specs=(
            pl.BlockSpec((B, TQ, out_dim), lambda qi: (0, qi, 0)),
            pl.BlockSpec((nh, B, TQ, Lk_pad), lambda qi: (0, 0, qi, 0)),
        ),
        out_shape=(
            jax.ShapeDtypeStruct((B, Lq_pad, out_dim), jnp.float32),
            jax.ShapeDtypeStruct((nh, B, Lq_pad, Lk_pad), jnp.float32),
        ),
        compiler_params=pltpu.CompilerParams(
            dimension_semantics=("parallel",),
            vmem_limit_bytes=vmem_limit),
        cost_estimate=pl.CostEstimate(
            flops=flops,
            transcendentals=nh * B * Lq_pad * Lk_pad,
            bytes_accessed=bytes_accessed),
    )(qp, kx, kxt, wq_hm, bq_hm, wp_hm, bp)

    out = out[:, :Lq, :]
    score = score4.reshape(nh * B, Lq_pad, Lk_pad)[:, :Lq, :Lk]
    return out, score


def _reference(k, q, params, n_head, hidden_dim):
    """Pure-JAX reference mirroring the PyTorch forward (dot_product)."""
    wk, bk, wq, bq, wp, bp = params
    B, Lk, E = k.shape
    Lq = q.shape[1]
    H = hidden_dim
    kx = (k.reshape(B * Lk, E) @ wk + bk[0]).reshape(B, Lk, n_head, H)
    kx = jnp.transpose(kx, (2, 0, 1, 3)).reshape(n_head * B, Lk, H)
    qx = (q.reshape(B * Lq, E) @ wq + bq[0]).reshape(B, Lq, n_head, H)
    qx = jnp.transpose(qx, (2, 0, 1, 3)).reshape(n_head * B, Lq, H)
    score = jnp.einsum('nqh,nkh->nqk', qx, kx)
    score = jax.nn.softmax(score, axis=0)          # dim=0 softmax, as in torch code
    output = jnp.einsum('nqk,nkh->nqh', score, kx)
    output = jnp.concatenate(jnp.split(output, n_head, axis=0), axis=-1)
    output = output @ wp + bp[0]
    return output, score


if __name__ == "__main__":
    key = jax.random.PRNGKey(0)
    B, Lk, Lq = 2, 8, 8
    embed_dim = 32
    n_head = 2
    hidden_dim = embed_dim // n_head     # 16
    out_dim = embed_dim

    keys = jax.random.split(key, 8)

    def unif(kk, shape, bound):
        return jax.random.uniform(kk, shape, jnp.float32, -bound, bound)

    # nn.Linear-style uniform init (deterministic, synthetic weights)
    b_kq = 1.0 / math.sqrt(embed_dim)
    wk = unif(keys[0], (embed_dim, n_head * hidden_dim), b_kq)
    bk = unif(keys[1], (1, n_head * hidden_dim), b_kq)
    wq = unif(keys[2], (embed_dim, n_head * hidden_dim), b_kq)
    bq = unif(keys[3], (1, n_head * hidden_dim), b_kq)
    b_p = 1.0 / math.sqrt(n_head * hidden_dim)
    wp = unif(keys[4], (n_head * hidden_dim, out_dim), b_p)
    bp = unif(keys[5], (1, out_dim), b_p)
    params = (wk, bk, wq, bq, wp, bp)

    k = jax.random.normal(keys[6], (B, Lk, embed_dim), jnp.float32)
    q = jax.random.normal(keys[7], (B, Lq, embed_dim), jnp.float32)

    out, score = attention_forward(k, q, params, n_head, hidden_dim)
    jax.block_until_ready(out)
    jax.block_until_ready(score)

    ref_out, ref_score = _reference(k, q, params, n_head, hidden_dim)
    assert out.shape == ref_out.shape and score.shape == ref_score.shape
    assert jnp.allclose(out, ref_out, atol=1e-4, rtol=1e-4), "output mismatch"
    assert jnp.allclose(score, ref_score, atol=1e-5, rtol=1e-4), "score mismatch"

    # TODO(synk): score_function 'scaled_dot_product'/'mlp'/'bi_linear' and
    # nonzero dropout (would need pltpu.prng_*) are not implemented; the module
    # defaults used here are 'dot_product' and dropout=0 (identity).
    print("KERNEL_OK")
</pallas_src>

<mosaic_0001>
module attributes {stable_mosaic.version = 11 : i64} {
  func.func @_attention_kernel(%arg0: i32, %arg1: memref<2x8x32xf32, #tpu.memory_space<vmem>>, %arg2: memref<2x2x128x16xf32, #tpu.memory_space<vmem>>, %arg3: memref<2x2x16x128xf32, #tpu.memory_space<vmem>>, %arg4: memref<2x32x16xf32, #tpu.memory_space<vmem>>, %arg5: memref<2x1x16xf32, #tpu.memory_space<vmem>>, %arg6: memref<2x16x32xf32, #tpu.memory_space<vmem>>, %arg7: memref<1x32xf32, #tpu.memory_space<vmem>>, %arg8: memref<2x8x32xf32, #tpu.memory_space<vmem>>, %arg9: memref<2x2x8x128xf32, #tpu.memory_space<vmem>>) attributes {dimension_semantics = [#tpu.dimension_semantics<parallel>], iteration_bounds = array<i64: 1>, scalar_prefetch = 0 : i64, scratch_operands = 0 : i64, tpu.core_type = #tpu.core_type<tc>, window_params = [{transform_indices = @transform_0, window_bounds = array<i64: 2, 8, 32>}, {pipeline_mode = #tpu.pipeline_mode<synchronous>, transform_indices = @transform_1, window_bounds = array<i64: 2, 2, 128, 16>}, {pipeline_mode = #tpu.pipeline_mode<synchronous>, transform_indices = @transform_2, window_bounds = array<i64: 2, 2, 16, 128>}, {pipeline_mode = #tpu.pipeline_mode<synchronous>, transform_indices = @transform_3, window_bounds = array<i64: 2, 32, 16>}, {pipeline_mode = #tpu.pipeline_mode<synchronous>, transform_indices = @transform_4, window_bounds = array<i64: 2, 1, 16>}, {pipeline_mode = #tpu.pipeline_mode<synchronous>, transform_indices = @transform_5, window_bounds = array<i64: 2, 16, 32>}, {pipeline_mode = #tpu.pipeline_mode<synchronous>, transform_indices = @transform_6, window_bounds = array<i64: 1, 32>}, {transform_indices = @transform_7, window_bounds = array<i64: 2, 8, 32>}, {transform_indices = @transform_8, window_bounds = array<i64: 2, 2, 8, 128>}]} {
    %c0 = arith.constant 0 : index
    %c0_0 = arith.constant 0 : index
    %c0_1 = arith.constant 0 : index
    %0 = vector.load %arg1[%c0, %c0_0, %c0_1] : memref<2x8x32xf32, #tpu.memory_space<vmem>>, vector<2x8x32xf32>
    %1 = vector.shape_cast %0 : vector<2x8x32xf32> to vector<16x32xf32>
    %c0_2 = arith.constant 0 : index
    %c0_3 = arith.constant 0 : index
    %c0_4 = arith.constant 0 : index
    %2 = vector.load %arg4[%c0_2, %c0_3, %c0_4] : memref<2x32x16xf32, #tpu.memory_space<vmem>>, vector<1x32x16xf32>
    %3 = vector.shape_cast %2 : vector<1x32x16xf32> to vector<32x16xf32>
    %cst = arith.constant dense<0.000000e+00> : vector<16x16xf32>
    %4 = tpu.matmul %1, %3, %cst {dimension_numbers = #tpu.dot_dimension_numbers<[1], [0], [0], [1], [0, 0, 1, 1], [], []>} : vector<16x32xf32>, vector<32x16xf32>, vector<16x16xf32> -> vector<16x16xf32>
    %c0_5 = arith.constant 0 : index
    %c0_6 = arith.constant 0 : index
    %c0_7 = arith.constant 0 : index
    %5 = vector.load %arg5[%c0_5, %c0_6, %c0_7] : memref<2x1x16xf32, #tpu.memory_space<vmem>>, vector<1x1x16xf32>
    %6 = vector.shape_cast %5 : vector<1x1x16xf32> to vector<1x16xf32>
    %7 = vector.broadcast %6 : vector<1x16xf32> to vector<16x16xf32>
    %8 = arith.addf %4, %7 : vector<16x16xf32>
    %9 = vector.shape_cast %8 : vector<16x16xf32> to vector<2x8x16xf32>
    %c0_8 = arith.constant 0 : index
    %c0_9 = arith.constant 0 : index
    %c0_10 = arith.constant 0 : index
    %c0_11 = arith.constant 0 : index
    %10 = vector.load %arg3[%c0_8, %c0_9, %c0_10, %c0_11] : memref<2x2x16x128xf32, #tpu.memory_space<vmem>>, vector<1x2x16x128xf32>
    %11 = vector.shape_cast %10 : vector<1x2x16x128xf32> to vector<2x16x128xf32>
    "tpu.trace_start"() <{level = 10 : i32, message = "bqh,bhk->bqk"}> : () -> ()
    %cst_12 = arith.constant dense<0.000000e+00> : vector<2x8x128xf32>
    %12 = tpu.matmul %9, %11, %cst_12 {dimension_numbers = #tpu.dot_dimension_numbers<[2], [1], [1], [2], [0, 0, 0, 1, 1, 2], [0], [0]>} : vector<2x8x16xf32>, vector<2x16x128xf32>, vector<2x8x128xf32> -> vector<2x8x128xf32>
    "tpu.trace_stop"() : () -> ()
    %c1 = arith.constant 1 : index
    %c0_13 = arith.constant 0 : index
    %c0_14 = arith.constant 0 : index
    %13 = vector.load %arg4[%c1, %c0_13, %c0_14] : memref<2x32x16xf32, #tpu.memory_space<vmem>>, vector<1x32x16xf32>
    %14 = vector.shape_cast %13 : vector<1x32x16xf32> to vector<32x16xf32>
    %cst_15 = arith.constant dense<0.000000e+00> : vector<16x16xf32>
    %15 = tpu.matmul %1, %14, %cst_15 {dimension_numbers = #tpu.dot_dimension_numbers<[1], [0], [0], [1], [0, 0, 1, 1], [], []>} : vector<16x32xf32>, vector<32x16xf32>, vector<16x16xf32> -> vector<16x16xf32>
    %c1_16 = arith.constant 1 : index
    %c0_17 = arith.constant 0 : index
    %c0_18 = arith.constant 0 : index
    %16 = vector.load %arg5[%c1_16, %c0_17, %c0_18] : memref<2x1x16xf32, #tpu.memory_space<vmem>>, vector<1x1x16xf32>
    %17 = vector.shape_cast %16 : vector<1x1x16xf32> to vector<1x16xf32>
    %18 = vector.broadcast %17 : vector<1x16xf32> to vector<16x16xf32>
    %19 = arith.addf %15, %18 : vector<16x16xf32>
    %20 = vector.shape_cast %19 : vector<16x16xf32> to vector<2x8x16xf32>
    %c1_19 = arith.constant 1 : index
    %c0_20 = arith.constant 0 : index
    %c0_21 = arith.constant 0 : index
    %c0_22 = arith.constant 0 : index
    %21 = vector.load %arg3[%c1_19, %c0_20, %c0_21, %c0_22] : memref<2x2x16x128xf32, #tpu.memory_space<vmem>>, vector<1x2x16x128xf32>
    %22 = vector.shape_cast %21 : vector<1x2x16x128xf32> to vector<2x16x128xf32>
    "tpu.trace_start"() <{level = 10 : i32, message = "bqh,bhk->bqk"}> : () -> ()
    %cst_23 = arith.constant dense<0.000000e+00> : vector<2x8x128xf32>
    %23 = tpu.matmul %20, %22, %cst_23 {dimension_numbers = #tpu.dot_dimension_numbers<[2], [1], [1], [2], [0, 0, 0, 1, 1, 2], [0], [0]>} : vector<2x8x16xf32>, vector<2x16x128xf32>, vector<2x8x128xf32> -> vector<2x8x128xf32>
    "tpu.trace_stop"() : () -> ()
    %cst_24 = arith.constant dense<0xFF800000> : vector<8x128xf32>
    %24 = vector.multi_reduction <maximumf>, %12, %cst_24 [0] : vector<2x8x128xf32> to vector<8x128xf32>
    %25 = vector.shape_cast %24 : vector<8x128xf32> to vector<1x8x128xf32>
    %cst_25 = arith.constant dense<0xFF800000> : vector<8x128xf32>
    %26 = vector.multi_reduction <maximumf>, %23, %cst_25 [0] : vector<2x8x128xf32> to vector<8x128xf32>
    %27 = vector.shape_cast %26 : vector<8x128xf32> to vector<1x8x128xf32>
    %28 = arith.maximumf %25, %27 : vector<1x8x128xf32>
    %29 = vector.broadcast %28 : vector<1x8x128xf32> to vector<2x8x128xf32>
    %30 = arith.subf %12, %29 : vector<2x8x128xf32>
    %31 = math.exp %30 : vector<2x8x128xf32>
    %32 = vector.broadcast %28 : vector<1x8x128xf32> to vector<2x8x128xf32>
    %33 = arith.subf %23, %32 : vector<2x8x128xf32>
    %34 = math.exp %33 : vector<2x8x128xf32>
    %cst_26 = arith.constant dense<0.000000e+00> : vector<8x128xf32>
    %35 = vector.multi_reduction <add>, %31, %cst_26 [0] : vector<2x8x128xf32> to vector<8x128xf32>
    %36 = vector.shape_cast %35 : vector<8x128xf32> to vector<1x8x128xf32>
    %cst_27 = arith.constant dense<0.000000e+00> : vector<8x128xf32>
    %37 = vector.multi_reduction <add>, %34, %cst_27 [0] : vector<2x8x128xf32> to vector<8x128xf32>
    %38 = vector.shape_cast %37 : vector<8x128xf32> to vector<1x8x128xf32>
    %39 = arith.addf %36, %38 : vector<1x8x128xf32>
    %cst_28 = arith.constant 1.000000e+00 : f32
    %40 = vector.broadcast %cst_28 : f32 to vector<1x8x128xf32>
    %41 = arith.divf %40, %39 : vector<1x8x128xf32>
    %cst_29 = arith.constant 0.000000e+00 : f32
    %42 = vector.broadcast %cst_29 : f32 to vector<16x32xf32>
    %43 = vector.broadcast %41 : vector<1x8x128xf32> to vector<2x8x128xf32>
    %44 = arith.mulf %31, %43 : vector<2x8x128xf32>
    %c0_30 = arith.constant 0 : index
    %c0_31 = arith.constant 0 : index
    %c0_32 = arith.constant 0 : index
    %c0_33 = arith.constant 0 : index
    %45 = vector.load %arg9[%c0_30, %c0_31, %c0_32, %c0_33] : memref<2x2x8x128xf32, #tpu.memory_space<vmem>>, vector<1x2x8x128xf32>
    %46 = vector.shape_cast %45 : vector<1x2x8x128xf32> to vector<2x8x128xf32>
    %47 = vector.shape_cast %44 : vector<2x8x128xf32> to vector<1x2x8x128xf32>
    tpu.vector_store %arg9[%c0_30, %c0_31, %c0_32, %c0_33], %47 {strides = array<i32>} : memref<2x2x8x128xf32, #tpu.memory_space<vmem>>, vector<1x2x8x128xf32>,
    %c0_34 = arith.constant 0 : index
    %c0_35 = arith.constant 0 : index
    %c0_36 = arith.constant 0 : index
    %c0_37 = arith.constant 0 : index
    %48 = vector.load %arg2[%c0_34, %c0_35, %c0_36, %c0_37] : memref<2x2x128x16xf32, #tpu.memory_space<vmem>>, vector<1x2x128x16xf32>
    %49 = vector.shape_cast %48 : vector<1x2x128x16xf32> to vector<2x128x16xf32>
    "tpu.trace_start"() <{level = 10 : i32, message = "bqk,bkh->bqh"}> : () -> ()
    %cst_38 = arith.constant dense<0.000000e+00> : vector<2x8x16xf32>
    %50 = tpu.matmul %44, %49, %cst_38 {dimension_numbers = #tpu.dot_dimension_numbers<[2], [1], [1], [2], [0, 0, 0, 1, 1, 2], [0], [0]>} : vector<2x8x128xf32>, vector<2x128x16xf32>, vector<2x8x16xf32> -> vector<2x8x16xf32>
    "tpu.trace_stop"() : () -> ()
    %51 = vector.shape_cast %50 : vector<2x8x16xf32> to vector<16x16xf32>
    %c0_39 = arith.constant 0 : index
    %c0_40 = arith.constant 0 : index
    %c0_41 = arith.constant 0 : index
    %52 = vector.load %arg6[%c0_39, %c0_40, %c0_41] : memref<2x16x32xf32, #tpu.memory_space<vmem>>, vector<1x16x32xf32>
    %53 = vector.shape_cast %52 : vector<1x16x32xf32> to vector<16x32xf32>
    %cst_42 = arith.constant dense<0.000000e+00> : vector<16x32xf32>
    %54 = tpu.matmul %51, %53, %cst_42 {dimension_numbers = #tpu.dot_dimension_numbers<[1], [0], [0], [1], [0, 0, 1, 1], [], []>} : vector<16x16xf32>, vector<16x32xf32>, vector<16x32xf32> -> vector<16x32xf32>
    %55 = arith.addf %42, %54 : vector<16x32xf32>
    %56 = vector.broadcast %41 : vector<1x8x128xf32> to vector<2x8x128xf32>
    %57 = arith.mulf %34, %56 : vector<2x8x128xf32>
    %c1_43 = arith.constant 1 : index
    %c0_44 = arith.constant 0 : index
    %c0_45 = arith.constant 0 : index
    %c0_46 = arith.constant 0 : index
    %58 = vector.load %arg9[%c1_43, %c0_44, %c0_45, %c0_46] : memref<2x2x8x128xf32, #tpu.memory_space<vmem>>, vector<1x2x8x128xf32>
    %59 = vector.shape_cast %58 : vector<1x2x8x128xf32> to vector<2x8x128xf32>
    %60 = vector.shape_cast %57 : vector<2x8x128xf32> to vector<1x2x8x128xf32>
    tpu.vector_store %arg9[%c1_43, %c0_44, %c0_45, %c0_46], %60 {strides = array<i32>} : memref<2x2x8x128xf32, #tpu.memory_space<vmem>>, vector<1x2x8x128xf32>,
    %c1_47 = arith.constant 1 : index
    %c0_48 = arith.constant 0 : index
    %c0_49 = arith.constant 0 : index
    %c0_50 = arith.constant 0 : index
    %61 = vector.load %arg2[%c1_47, %c0_48, %c0_49, %c0_50] : memref<2x2x128x16xf32, #tpu.memory_space<vmem>>, vector<1x2x128x16xf32>
    %62 = vector.shape_cast %61 : vector<1x2x128x16xf32> to vector<2x128x16xf32>
    "tpu.trace_start"() <{level = 10 : i32, message = "bqk,bkh->bqh"}> : () -> ()
    %cst_51 = arith.constant dense<0.000000e+00> : vector<2x8x16xf32>
    %63 = tpu.matmul %57, %62, %cst_51 {dimension_numbers = #tpu.dot_dimension_numbers<[2], [1], [1], [2], [0, 0, 0, 1, 1, 2], [0], [0]>} : vector<2x8x128xf32>, vector<2x128x16xf32>, vector<2x8x16xf32> -> vector<2x8x16xf32>
    "tpu.trace_stop"() : () -> ()
    %64 = vector.shape_cast %63 : vector<2x8x16xf32> to vector<16x16xf32>
    %c1_52 = arith.constant 1 : index
    %c0_53 = arith.constant 0 : index
    %c0_54 = arith.constant 0 : index
    %65 = vector.load %arg6[%c1_52, %c0_53, %c0_54] : memref<2x16x32xf32, #tpu.memory_space<vmem>>, vector<1x16x32xf32>
    %66 = vector.shape_cast %65 : vector<1x16x32xf32> to vector<16x32xf32>
    %cst_55 = arith.constant dense<0.000000e+00> : vector<16x32xf32>
    %67 = tpu.matmul %64, %66, %cst_55 {dimension_numbers = #tpu.dot_dimension_numbers<[1], [0], [0], [1], [0, 0, 1, 1], [], []>} : vector<16x16xf32>, vector<16x32xf32>, vector<16x32xf32> -> vector<16x32xf32>
    %68 = arith.addf %55, %67 : vector<16x32xf32>
    %c0_56 = arith.constant 0 : index
    %c0_57 = arith.constant 0 : index
    %69 = vector.load %arg7[%c0_56, %c0_57] : memref<1x32xf32, #tpu.memory_space<vmem>>, vector<1x32xf32>
    %70 = vector.broadcast %69 : vector<1x32xf32> to vector<16x32xf32>
    %71 = arith.addf %68, %70 : vector<16x32xf32>
    %72 = vector.shape_cast %71 : vector<16x32xf32> to vector<2x8x32xf32>
    %c0_58 = arith.constant 0 : index
    %c0_59 = arith.constant 0 : index
    %c0_60 = arith.constant 0 : index
    %73 = vector.load %arg8[%c0_58, %c0_59, %c0_60] : memref<2x8x32xf32, #tpu.memory_space<vmem>>, vector<2x8x32xf32>
    tpu.vector_store %arg8[%c0_58, %c0_59, %c0_60], %72 {strides = array<i32>} : memref<2x8x32xf32, #tpu.memory_space<vmem>>, vector<2x8x32xf32>,
    return
  }
  func.func @transform_0(%arg0: i32) -> (i32, i32, i32) {
    %c0_i32 = arith.constant 0 : i32
    %c0_i32_0 = arith.constant 0 : i32
    %c0_i32_1 = arith.constant 0 : i32
    return %c0_i32, %arg0, %c0_i32_0 : i32, i32, i32
  }
  func.func @transform_1(%arg0: i32) -> (i32, i32, i32, i32) {
    %c0_i32 = arith.constant 0 : i32
    %c0_i32_0 = arith.constant 0 : i32
    %c0_i32_1 = arith.constant 0 : i32
    %c0_i32_2 = arith.constant 0 : i32
    %c0_i32_3 = arith.constant 0 : i32
    return %c0_i32, %c0_i32_0, %c0_i32_1, %c0_i32_2 : i32, i32, i32, i32
  }
  func.func @transform_2(%arg0: i32) -> (i32, i32, i32, i32) {
    %c0_i32 = arith.constant 0 : i32
    %c0_i32_0 = arith.constant 0 : i32
    %c0_i32_1 = arith.constant 0 : i32
    %c0_i32_2 = arith.constant 0 : i32
    %c0_i32_3 = arith.constant 0 : i32
    return %c0_i32, %c0_i32_0, %c0_i32_1, %c0_i32_2 : i32, i32, i32, i32
  }
  func.func @transform_3(%arg0: i32) -> (i32, i32, i32) {
    %c0_i32 = arith.constant 0 : i32
    %c0_i32_0 = arith.constant 0 : i32
    %c0_i32_1 = arith.constant 0 : i32
    %c0_i32_2 = arith.constant 0 : i32
    return %c0_i32, %c0_i32_0, %c0_i32_1 : i32, i32, i32
  }
  func.func @transform_4(%arg0: i32) -> (i32, i32, i32) {
    %c0_i32 = arith.constant 0 : i32
    %c0_i32_0 = arith.constant 0 : i32
    %c0_i32_1 = arith.constant 0 : i32
    %c0_i32_2 = arith.constant 0 : i32
    return %c0_i32, %c0_i32_0, %c0_i32_1 : i32, i32, i32
  }
  func.func @transform_5(%arg0: i32) -> (i32, i32, i32) {
    %c0_i32 = arith.constant 0 : i32
    %c0_i32_0 = arith.constant 0 : i32
    %c0_i32_1 = arith.constant 0 : i32
    %c0_i32_2 = arith.constant 0 : i32
    return %c0_i32, %c0_i32_0, %c0_i32_1 : i32, i32, i32
  }
  func.func @transform_6(%arg0: i32) -> (i32, i32) {
    %c0_i32 = arith.constant 0 : i32
    %c0_i32_0 = arith.constant 0 : i32
    %c0_i32_1 = arith.constant 0 : i32
    return %c0_i32, %c0_i32_0 : i32, i32
  }
  func.func @transform_7(%arg0: i32) -> (i32, i32, i32) {
    %c0_i32 = arith.constant 0 : i32
    %c0_i32_0 = arith.constant 0 : i32
    %c0_i32_1 = arith.constant 0 : i32
    return %c0_i32, %arg0, %c0_i32_0 : i32, i32, i32
  }
  func.func @transform_8(%arg0: i32) -> (i32, i32, i32, i32) {
    %c0_i32 = arith.constant 0 : i32
    %c0_i32_0 = arith.constant 0 : i32
    %c0_i32_1 = arith.constant 0 : i32
    %c0_i32_2 = arith.constant 0 : i32
    return %c0_i32, %c0_i32_0, %arg0, %c0_i32_1 : i32, i32, i32, i32
  }
}

</mosaic_0001>

<bundles_post_ra>
// kernel: tpu_custom_call.1
= control target key start
LH: loop header
LB: loop body
LE: loop exit
PB: predicated region body
PF: predicated region fallthrough
CT: control target
= control target key end

     0   :  { %14 = vsyncpa [#allocation3], 0  ;;  %vm43_vm0 = vcmask 261120   ;;  %s1955_s0 = inlined_call_operand.vmem [shape: f32[2,8,32], index: 0, kind: input, shape index: {}]   ;;  %s1956_s1 = inlined_call_operand.vmem [shape: f32[2,2,128,16], index: 1, kind: input, shape index: {}]   ;;  %s1957_s2 = inlined_call_operand.vmem [shape: f32[2,2,16,128], index: 2, kind: input, shape index: {}]   ;;  %s1958_s3 = inlined_call_operand.vmem [shape: f32[2,32,16], index: 3, kind: input, shape index: {}]   ;;  %s1959_s4 = inlined_call_operand.vmem [shape: f32[2,1,16], index: 4, kind: input, shape index: {}]   ;;  %s1960_s5 = inlined_call_operand.vmem [shape: f32[2,16,32], index: 5, kind: input, shape index: {}]   ;;  %s1961_s6 = inlined_call_operand.vmem [shape: f32[1,32], index: 6, kind: input, shape index: {}]   ;;  %s1962_s7 = inlined_call_operand.hbm [shape: f32[2,8,32], index: 7, kind: output, shape index: {0}]   ;;  %s1963_s8 = inlined_call_operand.hbm [shape: f32[2,2,8,128], index: 8, kind: output, shape index: {1}]  }
   0x1   :  { %v35_v0 = vld [vmem:[%s1958_s3 + $0x18] sm:$0xff]  ;;  %v34_v1 = vld [vmem:[%s1958_s3 + $0x10] sm:$0xff]  ;;  %v30_v2 = vld [vmem:[%s1955_s0] sm:$0xff] }
   0x2   :  { %1257 = vmatprep.subr.mxu0 %v35_v0  ;;  %v33_v3 = vld [vmem:[%s1958_s3 + $0x8] sm:$0xff]  ;;  %1265 = vmatprep.mubr.msk.f32.mxu0 %vm43_vm0, %v30_v2 }
   0x3   :  { %1258 = vmatpush3.msra.mxu0 %v35_v0 }
   0x4   :  { %1259 = vmatprep.subr.mxu0 %v34_v1 }
   0x5   :  { %15 = vsyncpa [#allocation5], 0  ;;  %1260 = vmatpush3.msra.mxu0 %v34_v1  ;;  %v32_v4 = vld [vmem:[%s1958_s3] sm:$0xff]  ;;  %v31_v5 = vld [vmem:[%s1955_s0 + $0x8] sm:$0xff]  ;;  %v1521_v10 = vmov 0.0   ;;  %vm1522_vm1 = vmmov 0  }
   0x6   :  { %1261 = vmatprep.subr.mxu0 %v33_v3  ;;  %v1107_v6 = vld [vmem:[%s1958_s3 + $0x38] sm:$0xff]  ;;  %v1106_v7 = vld [vmem:[%s1958_s3 + $0x30] sm:$0xff]  ;;  %v1105_v8 = vld [vmem:[%s1958_s3 + $0x28] sm:$0xff]  ;;  %1268 = vmatprep.subr.mxu1 %v1521_v10  ;;  %vm129_vm2 = vcmask 130048  }
   0x7   :  { %1262 = vmatpush3.msra.mxu0 %v33_v3  ;;  %v1104_v9 = vld [vmem:[%s1958_s3 + $0x20] sm:$0xff]  ;;  %v126_v11 = vld [vmem:[%s1957_s2 + $0x8] sm:$0xff]  ;;  %1272 = vmatprep.mubr.msk.f32.mxu1 %vm1522_vm1, %v1521_v10  ;;  %v128_v17 = vld [vmem:[%s1957_s2 + $0x18] sm:$0xff] }
   0x8   :  { %1263 = vmatprep.subr.mxu0 %v32_v4  ;;  %1269 = vmatpush3.msra.mxu1 %v126_v11  ;;  %v125_v12 = vld [vmem:[%s1957_s2] sm:$0xff]  ;;  %v127_v18 = vld [vmem:[%s1957_s2 + $0x10] sm:$0xff]  ;;  %v1113_v20 = vld [vmem:[%s1957_s2 + $0x28] sm:$0xff] }
   0x9   :  { %1264 = vmatpush3.msra.mxu0 %v32_v4  ;;  %1270 = vmatprep.subr.mxu1 %v1521_v10  ;;  %v1099_v14 = vld [vmem:[%s1959_s4] ss:$0 sm:$0xff]  ;;  %v1109_v23 = vld [vmem:[%s1959_s4 + $0x1] ss:$0 sm:$0xff]  ;;  %v1115_v26 = vld [vmem:[%s1957_s2 + $0x38] sm:$0xff] }
   0xa   :  { %1266 = vmatmul.mubr.msk.f32.vlgmr.msra.gmra.mxu0 %vm43_vm0, %v31_v5  ;;  %1282 = vmatprep.subr.mxu0 %v1107_v6  ;;  %v1112_v22 = vld [vmem:[%s1957_s2 + $0x20] sm:$0xff]  ;;  %v1114_v27 = vld [vmem:[%s1957_s2 + $0x30] sm:$0xff]  ;;  %v554_v29 = vld [vmem:[%s1956_s1 + $0x78] sm:$0xff] }
   0xb   :  { %1283 = vmatpush3.msra.mxu0 %v1107_v6  ;;  %1290 = vmatprep.mubr.msk.f32.mxu0 %vm43_vm0, %v30_v2  ;;  %v570_v30 = vld [vmem:[%s1956_s1 + $0xf8] sm:$0xff]  ;;  %v553_v31 = vld [vmem:[%s1956_s1 + $0x70] sm:$0xff]  ;;  %v552_v33 = vld [vmem:[%s1956_s1 + $0x68] sm:$0xff] }
   0xc   :  { %1284 = vmatprep.subr.mxu0 %v1106_v7  ;;  %1271 = vmatpush3.msra.mxu1 %v125_v12  ;;  %v569_v32 = vld [vmem:[%s1956_s1 + $0xf0] sm:$0xff]  ;;  %v568_v34 = vld [vmem:[%s1956_s1 + $0xe8] sm:$0xff]  ;;  %v551_v35 = vld [vmem:[%s1956_s1 + $0x60] sm:$0xff] }
   0xd   :  { %1285 = vmatpush3.msra.mxu0 %v1106_v7  ;;  %1275 = vmatprep.subr.mxu1 %v1521_v10  ;;  %v567_v36 = vld [vmem:[%s1956_s1 + $0xe0] sm:$0xff]  ;;  %v550_v37 = vld [vmem:[%s1956_s1 + $0x58] sm:$0xff]  ;;  %v549_v39 = vld [vmem:[%s1956_s1 + $0x50] sm:$0xff] }
   0xe   :  { %1286 = vmatprep.subr.mxu0 %v1105_v8  ;;  %v566_v38 = vld [vmem:[%s1956_s1 + $0xd8] sm:$0xff]  ;;  %v565_v40 = vld [vmem:[%s1956_s1 + $0xd0] sm:$0xff]  ;;  %v548_v41 = vld [vmem:[%s1956_s1 + $0x48] sm:$0xff] }
   0xf   :  { %1287 = vmatpush3.msra.mxu0 %v1105_v8  ;;  %v564_v42 = vld [vmem:[%s1956_s1 + $0xc8] sm:$0xff]  ;;  %v547_v43 = vld [vmem:[%s1956_s1 + $0x40] sm:$0xff]  ;;  %v546_v45 = vld [vmem:[%s1956_s1 + $0x38] sm:$0xff] }
  0x10   :  { %1288 = vmatprep.subr.mxu0 %v1104_v9  ;;  %v563_v44 = vld [vmem:[%s1956_s1 + $0xc0] sm:$0xff]  ;;  %v562_v46 = vld [vmem:[%s1956_s1 + $0xb8] sm:$0xff]  ;;  %v545_v47 = vld [vmem:[%s1956_s1 + $0x30] sm:$0xff] }
  0x11   :  { %1289 = vmatpush3.msra.mxu0 %v1104_v9  ;;  %v561_v48 = vld [vmem:[%s1956_s1 + $0xb0] sm:$0xff]  ;;  %v544_v49 = vld [vmem:[%s1956_s1 + $0x28] sm:$0xff]  ;;  %v543_v51 = vld [vmem:[%s1956_s1 + $0x20] sm:$0xff] }
  0x12   :  { %1291 = vmatmul.mubr.msk.f32.vlgmr.msra.gmra.mxu0 %vm43_vm0, %v31_v5  ;;  %1307 = vmatprep.subr.mxu0 %v1521_v10  ;;  %v560_v50 = vld [vmem:[%s1956_s1 + $0xa8] sm:$0xff]  ;;  %v559_v52 = vld [vmem:[%s1956_s1 + $0xa0] sm:$0xff]  ;;  %v542_v53 = vld [vmem:[%s1956_s1 + $0x18] sm:$0xff] }
  0x13   :  { %1339 = vmatprep.mubr.msk.f32.mxu0 %vm1522_vm1, %v1521_v10  ;;  %1308 = vmatpush3.msra.mxu0 %v554_v29  ;;  %v558_v54 = vld [vmem:[%s1956_s1 + $0x98] sm:$0xff]  ;;  %v541_v55 = vld [vmem:[%s1956_s1 + $0x10] sm:$0xff]  ;;  %v540_v57 = vld [vmem:[%s1956_s1 + $0x8] sm:$0xff] }
  0x14   :  { %1309 = vmatprep.subr.mxu0 %v1521_v10  ;;  %v557_v56 = vld [vmem:[%s1956_s1 + $0x90] sm:$0xff]  ;;  %v556_v58 = vld [vmem:[%s1956_s1 + $0x88] sm:$0xff]  ;;  %v539_v59 = vld [vmem:[%s1956_s1] sm:$0xff] }
  0x15   :  { %1310 = vmatpush3.msra.mxu0 %v553_v31  ;;  %v555_v60 = vld [vmem:[%s1956_s1 + $0x80] sm:$0xff]  ;;  %v1132_v31 = vld [vmem:[%s1956_s1 + $0x170] sm:$0xff] }
  0x16   :  { %1311 = vmatprep.subr.mxu0 %v1521_v10 }
  0x17   :  { %1312 = vmatpush3.msra.mxu0 %v552_v33  ;;  %v1131_v33 = vld [vmem:[%s1956_s1 + $0x168] sm:$0xff] }
  0x18   :  { %1313 = vmatprep.subr.mxu0 %v1521_v10 }
  0x19   :  { %1314 = vmatpush3.msra.mxu0 %v551_v35  ;;  %v1130_v35 = vld [vmem:[%s1956_s1 + $0x160] sm:$0xff] }
  0x1a   :  { %1315 = vmatprep.subr.mxu0 %v1521_v10 }
  0x1b   :  { %1316 = vmatpush3.msra.mxu0 %v550_v37  ;;  %v1129_v37 = vld [vmem:[%s1956_s1 + $0x158] sm:$0xff] }
  0x1c   :  { %1317 = vmatprep.subr.mxu0 %v1521_v10 }
  0x1d   :  { %1318 = vmatpush3.msra.mxu0 %v549_v39  ;;  %v1128_v39 = vld [vmem:[%s1956_s1 + $0x150] sm:$0xff] }
  0x1e   :  { %1319 = vmatprep.subr.mxu0 %v1521_v10 }
  0x1f   :  { %1320 = vmatpush3.msra.mxu0 %v548_v41  ;;  %v1127_v41 = vld [vmem:[%s1956_s1 + $0x148] sm:$0xff] }
  0x20   :  { %1321 = vmatprep.subr.mxu0 %v1521_v10 }
  0x21   :  { %1322 = vmatpush3.msra.mxu0 %v547_v43  ;;  %v1126_v43 = vld [vmem:[%s1956_s1 + $0x140] sm:$0xff] }
  0x22   :  { %1323 = vmatprep.subr.mxu0 %v1521_v10 }
  0x23   :  { %1324 = vmatpush3.msra.mxu0 %v546_v45  ;;  %v1125_v45 = vld [vmem:[%s1956_s1 + $0x138] sm:$0xff] }
  0x24   :  { %1325 = vmatprep.subr.mxu0 %v1521_v10 }
  0x25   :  { %1326 = vmatpush3.msra.mxu0 %v545_v47  ;;  %v1124_v47 = vld [vmem:[%s1956_s1 + $0x130] sm:$0xff] }
  0x26   :  { %1327 = vmatprep.subr.mxu0 %v1521_v10 }
  0x27   :  { %1328 = vmatpush3.msra.mxu0 %v544_v49  ;;  %v1123_v49 = vld [vmem:[%s1956_s1 + $0x128] sm:$0xff] }
  0x28   :  { %1329 = vmatprep.subr.mxu0 %v1521_v10 }
  0x29   :  { %1330 = vmatpush3.msra.mxu0 %v543_v51  ;;  %v1122_v51 = vld [vmem:[%s1956_s1 + $0x120] sm:$0xff] }
  0x2a   :  { %1331 = vmatprep.subr.mxu0 %v1521_v10 }
  0x2b   :  { %1332 = vmatpush3.msra.mxu0 %v542_v53  ;;  %v1121_v53 = vld [vmem:[%s1956_s1 + $0x118] sm:$0xff] }
  0x2c   :  { %1333 = vmatprep.subr.mxu0 %v1521_v10 }
  0x2d   :  { %1334 = vmatpush3.msra.mxu0 %v541_v55  ;;  %v1120_v55 = vld [vmem:[%s1956_s1 + $0x110] sm:$0xff] }
  0x2e   :  { %1335 = vmatprep.subr.mxu0 %v1521_v10 }
  0x2f   :  { %1336 = vmatpush3.msra.mxu0 %v540_v57  ;;  %v1119_v57 = vld [vmem:[%s1956_s1 + $0x108] sm:$0xff] }
  0x30   :  { %1337 = vmatprep.subr.mxu0 %v1521_v10 }
  0x31   :  { %1338 = vmatpush3.msra.mxu0 %v539_v59  ;;  %v1118_v59 = vld [vmem:[%s1956_s1 + $0x100] sm:$0xff] }
  0x32   :  { %1377 = vmatprep.subr.mxu0 %v1521_v10 }
  0xca   :  { %v1267_v13 = vpop.f32.mrf.mxu0 }
  0xcb   :  { %v122_v19 = vadd.f32 %v1267_v13, %v1099_v14 }
  0xcc   :  { %v116_v15 = vpop.f32.mrf.mxu0 }
  0xcd   :  { %v117_v16 = vadd.f32 %v1099_v14, %v116_v15 }
  0xcf   :  { %1273 = vmatmul.mubr.msk.f32.vlgmr.msra.gmra.mxu1 %vm129_vm2, %v117_v16 }
  0xd0   :  { %1276 = vmatpush3.msra.mxu1 %v128_v17  ;;  %1279 = vmatprep.mubr.msk.f32.mxu1 %vm1522_vm1, %v1521_v10 }
  0xd1   :  { %1277 = vmatprep.subr.mxu1 %v1521_v10 }
  0xd2   :  { %1278 = vmatpush3.msra.mxu1 %v127_v18  ;;  %v1292_v21 = vpop.f32.mrf.mxu0 }
  0xd3   :  { %1293 = vmatprep.subr.mxu1 %v1521_v10  ;;  %1280 = vmatmul.mubr.msk.f32.vlgmr.msra.gmra.mxu1 %vm129_vm2, %v122_v19  ;;  %v361_v28 = vadd.f32 %v1292_v21, %v1109_v23 }
  0xd4   :  { %1294 = vmatpush3.msra.mxu1 %v1113_v20  ;;  %v355_v24 = vpop.f32.mrf.mxu0  ;;  %1297 = vmatprep.mubr.msk.f32.mxu1 %vm1522_vm1, %v1521_v10 }
  0xd5   :  { %v356_v25 = vadd.f32 %v1109_v23, %v355_v24  ;;  %1295 = vmatprep.subr.mxu1 %v1521_v10 }
  0xd6   :  { %1296 = vmatpush3.msra.mxu1 %v1112_v22 }
  0xd7   :  { %1300 = vmatprep.subr.mxu1 %v1521_v10  ;;  %1298 = vmatmul.mubr.msk.f32.vlgmr.msra.gmra.mxu1 %vm129_vm2, %v356_v25 }
  0xd8   :  { %1301 = vmatpush3.msra.mxu1 %v1115_v26  ;;  %1304 = vmatprep.mubr.msk.f32.mxu1 %vm1522_vm1, %v1521_v10 }
  0xd9   :  { %1302 = vmatprep.subr.mxu1 %v1521_v10 }
  0xda   :  { %1303 = vmatpush3.msra.mxu1 %v1114_v27  ;;  %v1133_v27 = vld [vmem:[%s1956_s1 + $0x178] sm:$0xff] }
  0xdb   :  { %1305 = vmatmul.mubr.msk.f32.vlgmr.msra.gmra.mxu1 %vm129_vm2, %v361_v28  ;;  %1342 = vmatprep.subr.mxu1 %v1521_v10  ;;  %v1149_v28 = vld [vmem:[%s1956_s1 + $0x1f8] sm:$0xff] }
  0xdc   :  { %1374 = vmatprep.mubr.msk.f32.mxu1 %vm1522_vm1, %v1521_v10  ;;  %1343 = vmatpush3.msra.mxu1 %v570_v30 }
  0xdd   :  { %1344 = vmatprep.subr.mxu1 %v1521_v10 }
  0xde   :  { %1345 = vmatpush3.msra.mxu1 %v569_v32  ;;  %v1148_v32 = vld [vmem:[%s1956_s1 + $0x1f0] sm:$0xff] }
  0xdf   :  { %1346 = vmatprep.subr.mxu1 %v1521_v10 }
  0xe0   :  { %1347 = vmatpush3.msra.mxu1 %v568_v34  ;;  %v1147_v34 = vld [vmem:[%s1956_s1 + $0x1e8] sm:$0xff] }
  0xe1   :  { %1348 = vmatprep.subr.mxu1 %v1521_v10 }
  0xe2   :  { %1349 = vmatpush3.msra.mxu1 %v567_v36  ;;  %v1146_v36 = vld [vmem:[%s1956_s1 + $0x1e0] sm:$0xff] }
  0xe3   :  { %1350 = vmatprep.subr.mxu1 %v1521_v10 }
  0xe4   :  { %1351 = vmatpush3.msra.mxu1 %v566_v38  ;;  %v1145_v38 = vld [vmem:[%s1956_s1 + $0x1d8] sm:$0xff] }
  0xe5   :  { %1352 = vmatprep.subr.mxu1 %v1521_v10 }
  0xe6   :  { %1353 = vmatpush3.msra.mxu1 %v565_v40  ;;  %v1144_v40 = vld [vmem:[%s1956_s1 + $0x1d0] sm:$0xff] }
  0xe7   :  { %1354 = vmatprep.subr.mxu1 %v1521_v10 }
  0xe8   :  { %1355 = vmatpush3.msra.mxu1 %v564_v42  ;;  %v1143_v42 = vld [vmem:[%s1956_s1 + $0x1c8] sm:$0xff] }
  0xe9   :  { %1356 = vmatprep.subr.mxu1 %v1521_v10 }
  0xea   :  { %1357 = vmatpush3.msra.mxu1 %v563_v44  ;;  %v1142_v44 = vld [vmem:[%s1956_s1 + $0x1c0] sm:$0xff] }
  0xeb   :  { %1358 = vmatprep.subr.mxu1 %v1521_v10 }
  0xec   :  { %1359 = vmatpush3.msra.mxu1 %v562_v46  ;;  %v1141_v46 = vld [vmem:[%s1956_s1 + $0x1b8] sm:$0xff] }
  0xed   :  { %1360 = vmatprep.subr.mxu1 %v1521_v10 }
  0xee   :  { %1361 = vmatpush3.msra.mxu1 %v561_v48  ;;  %v1140_v48 = vld [vmem:[%s1956_s1 + $0x1b0] sm:$0xff] }
  0xef   :  { %1362 = vmatprep.subr.mxu1 %v1521_v10 }
  0xf0   :  { %1363 = vmatpush3.msra.mxu1 %v560_v50  ;;  %v1139_v50 = vld [vmem:[%s1956_s1 + $0x1a8] sm:$0xff] }
  0xf1   :  { %1364 = vmatprep.subr.mxu1 %v1521_v10 }
  0xf2   :  { %1365 = vmatpush3.msra.mxu1 %v559_v52  ;;  %v1138_v52 = vld [vmem:[%s1956_s1 + $0x1a0] sm:$0xff] }
  0xf3   :  { %1366 = vmatprep.subr.mxu1 %v1521_v10 }
  0xf4   :  { %1367 = vmatpush3.msra.mxu1 %v558_v54  ;;  %v1137_v54 = vld [vmem:[%s1956_s1 + $0x198] sm:$0xff] }
  0xf5   :  { %1368 = vmatprep.subr.mxu1 %v1521_v10 }
  0xf6   :  { %1369 = vmatpush3.msra.mxu1 %v557_v56  ;;  %v1136_v56 = vld [vmem:[%s1956_s1 + $0x190] sm:$0xff] }
  0xf7   :  { %1370 = vmatprep.subr.mxu1 %v1521_v10 }
  0xf8   :  { %1371 = vmatpush3.msra.mxu1 %v556_v58  ;;  %v1135_v58 = vld [vmem:[%s1956_s1 + $0x188] sm:$0xff] }
  0xf9   :  { %1372 = vmatprep.subr.mxu1 %v1521_v10 }
  0xfa   :  { %1373 = vmatpush3.msra.mxu1 %v555_v60  ;;  %v1134_v60 = vld [vmem:[%s1956_s1 + $0x180] sm:$0xff] }
  0xfb   :  { %1412 = vmatprep.subr.mxu1 %v1521_v10 }
 0x18f   :  { %v199_v61 = vpop.f32.mrf.mxu1 }
 0x191   :  { %v1274_v62 = vpop.f32.mrf.mxu1 }
 0x192   :  { %v711_v62 = vld [vmem:[%s1960_s5] sm:$0xff] }
 0x193   :  { %v272_v63 = vpop.f32.mrf.mxu1 }
 0x194   :  { %v515_v4 = vmax.f32 %v199_v61, %v272_v63 }
 0x195   :  { %v1281_v0 = vpop.f32.mrf.mxu1 }
 0x197   :  { %v438_v1 = vpop.f32.mrf.mxu1 }
 0x199   :  { %v1299_v2 = vpop.f32.mrf.mxu1 }
 0x19b   :  { %v511_v3 = vpop.f32.mrf.mxu1 }
 0x19c   :  { %v516_v5 = vmax.f32 %v438_v1, %v511_v3 }
 0x19d   :  { %v1306_v6 = vpop.f32.mrf.mxu1 }
 0x19e   :  { %v517_v7 = vmax.f32 %v515_v4, %v516_v5 }
 0x1a0   :  { %v518_v8 = vsub.f32 %v199_v61, %v517_v7  ;;  %v519_v9 = vsub.f32 %v272_v63, %v517_v7  ;;  %v524_v11 = vsub.f32 %v438_v1, %v517_v7  ;;  %v525_v12 = vsub.f32 %v511_v3, %v517_v7  ;;  %v712_v61 = vld [vmem:[%s1960_s5 + $0x8] sm:$0xff]  ;;  %v1151_v63 = vld [vmem:[%s1960_s5 + $0x18] sm:$0xff] }
 0x1a2   :  { %v520_v13 = vmul.f32 1.442695, %v518_v8  ;;  %v522_v14 = vmul.f32 1.442695, %v519_v9  ;;  %v526_v15 = vmul.f32 1.442695, %v524_v11 }
 0x1a3   :  { %v528_v16 = vmul.f32 1.442695, %v525_v12 }
 0x1a4   :  { %1467 = vpow2.f32 %v520_v13 }
 0x1a5   :  { %1469 = vpow2.f32 %v522_v14 }
 0x1a6   :  { %1471 = vpow2.f32 %v526_v15 }
 0x1a7   :  { %1473 = vpow2.f32 %v528_v16 }
 0x1b1   :  { %v1468_v17 = vpop.eup %1467 }
 0x1b2   :  { %v1470_v18 = vpop.eup %1469 }
 0x1b3   :  { %v1472_v19 = vpop.eup %1471  ;;  %v530_v20 = vadd.f32 %v1470_v18, %v1468_v17 }
 0x1b4   :  { %v1474_v21 = vpop.eup %1473 }
 0x1b5   :  { %v531_v22 = vadd.f32 %v1474_v21, %v1472_v19 }
 0x1b7   :  { %v532_v23 = vadd.f32 %v531_v22, %v530_v20 }
 0x1b9   :  { %1475 = vrcp.f32 %v532_v23 }
 0x1c6   :  { %v1476_v24 = vpop.eup %1475 }
 0x1c7   :  { %v535_v25 = vmul.f32 %v1476_v24, %v1468_v17  ;;  %v536_v26 = vmul.f32 %v1476_v24, %v1470_v18  ;;  %v1796_v29 = vmul.f32 %v1476_v24, %v1472_v19  ;;  %v1798_v30 = vmul.f32 %v1476_v24, %v1474_v21 }
 0x1c9   :  { %537 = vst [vmem:[#allocation4] sm:$0xff] %v535_v25  ;;  %1340 = vmatmul.mubr.f32.vlgmr.msra.gmra.mxu0 %v535_v25  ;;  %538 = vst [vmem:[#allocation4 + $0x8] sm:$0xff] %v536_v26  ;;  %1375 = vmatmul.mubr.f32.vlgmr.msra.gmra.mxu1 %v536_v26 }
 0x1ca   :  { %716 = vst [vmem:[#allocation4 + $0x10] sm:$0xff] %v1796_v29  ;;  %717 = vst [vmem:[#allocation4 + $0x18] sm:$0xff] %v1798_v30  ;;  %1378 = vmatpush3.msra.mxu0 %v1133_v27  ;;  %1413 = vmatpush3.msra.mxu1 %v1149_v28 }
 0x1cb   :  { %1379 = vmatprep.subr.mxu0 %v1521_v10  ;;  %1414 = vmatprep.subr.mxu1 %v1521_v10 }
 0x1cc   :  { %1380 = vmatpush3.msra.mxu0 %v1132_v31  ;;  %1415 = vmatpush3.msra.mxu1 %v1148_v32 }
 0x1cd   :  { %1381 = vmatprep.subr.mxu0 %v1521_v10  ;;  %1416 = vmatprep.subr.mxu1 %v1521_v10 }
 0x1ce   :  { %1382 = vmatpush3.msra.mxu0 %v1131_v33  ;;  %1417 = vmatpush3.msra.mxu1 %v1147_v34 }
 0x1cf   :  { %1383 = vmatprep.subr.mxu0 %v1521_v10  ;;  %1418 = vmatprep.subr.mxu1 %v1521_v10 }
 0x1d0   :  { %1384 = vmatpush3.msra.mxu0 %v1130_v35  ;;  %1419 = vmatpush3.msra.mxu1 %v1146_v36 }
 0x1d1   :  { %1385 = vmatprep.subr.mxu0 %v1521_v10  ;;  %1420 = vmatprep.subr.mxu1 %v1521_v10 }
 0x1d2   :  { %1386 = vmatpush3.msra.mxu0 %v1129_v37  ;;  %1421 = vmatpush3.msra.mxu1 %v1145_v38 }
 0x1d3   :  { %1387 = vmatprep.subr.mxu0 %v1521_v10  ;;  %1422 = vmatprep.subr.mxu1 %v1521_v10 }
 0x1d4   :  { %1388 = vmatpush3.msra.mxu0 %v1128_v39  ;;  %1423 = vmatpush3.msra.mxu1 %v1144_v40 }
 0x1d5   :  { %1389 = vmatprep.subr.mxu0 %v1521_v10  ;;  %1424 = vmatprep.subr.mxu1 %v1521_v10 }
 0x1d6   :  { %1390 = vmatpush3.msra.mxu0 %v1127_v41  ;;  %1425 = vmatpush3.msra.mxu1 %v1143_v42 }
 0x1d7   :  { %1391 = vmatprep.subr.mxu0 %v1521_v10  ;;  %1426 = vmatprep.subr.mxu1 %v1521_v10 }
 0x1d8   :  { %1392 = vmatpush3.msra.mxu0 %v1126_v43  ;;  %1427 = vmatpush3.msra.mxu1 %v1142_v44 }
 0x1d9   :  { %1393 = vmatprep.subr.mxu0 %v1521_v10  ;;  %1428 = vmatprep.subr.mxu1 %v1521_v10 }
 0x1da   :  { %1394 = vmatpush3.msra.mxu0 %v1125_v45  ;;  %1429 = vmatpush3.msra.mxu1 %v1141_v46 }
 0x1db   :  { %1395 = vmatprep.subr.mxu0 %v1521_v10  ;;  %1430 = vmatprep.subr.mxu1 %v1521_v10 }
 0x1dc   :  { %1396 = vmatpush3.msra.mxu0 %v1124_v47  ;;  %1431 = vmatpush3.msra.mxu1 %v1140_v48 }
 0x1dd   :  { %1397 = vmatprep.subr.mxu0 %v1521_v10  ;;  %1432 = vmatprep.subr.mxu1 %v1521_v10 }
 0x1de   :  { %1398 = vmatpush3.msra.mxu0 %v1123_v49  ;;  %1433 = vmatpush3.msra.mxu1 %v1139_v50 }
 0x1df   :  { %1399 = vmatprep.subr.mxu0 %v1521_v10  ;;  %1434 = vmatprep.subr.mxu1 %v1521_v10 }
 0x1e0   :  { %1400 = vmatpush3.msra.mxu0 %v1122_v51  ;;  %1435 = vmatpush3.msra.mxu1 %v1138_v52 }
 0x1e1   :  { %1401 = vmatprep.subr.mxu0 %v1521_v10  ;;  %1436 = vmatprep.subr.mxu1 %v1521_v10 }
 0x1e2   :  { %1402 = vmatpush3.msra.mxu0 %v1121_v53  ;;  %1437 = vmatpush3.msra.mxu1 %v1137_v54 }
 0x1e3   :  { %1403 = vmatprep.subr.mxu0 %v1521_v10  ;;  %1438 = vmatprep.subr.mxu1 %v1521_v10 }
 0x1e4   :  { %1404 = vmatpush3.msra.mxu0 %v1120_v55  ;;  %1439 = vmatpush3.msra.mxu1 %v1136_v56 }
 0x1e5   :  { %1405 = vmatprep.subr.mxu0 %v1521_v10  ;;  %1440 = vmatprep.subr.mxu1 %v1521_v10 }
 0x1e6   :  { %1406 = vmatpush3.msra.mxu0 %v1119_v57  ;;  %1441 = vmatpush3.msra.mxu1 %v1135_v58 }
 0x1e7   :  { %1407 = vmatprep.subr.mxu0 %v1521_v10  ;;  %1442 = vmatprep.subr.mxu1 %v1521_v10 }
 0x1e8   :  { %1408 = vmatpush3.msra.mxu0 %v1118_v59  ;;  %1409 = vmatprep.mubr.msk.f32.mxu0 %vm1522_vm1, %v1521_v10 }
 0x1e9   :  { %1443 = vmatpush3.msra.mxu1 %v1134_v60  ;;  %1444 = vmatprep.mubr.msk.f32.mxu1 %vm1522_vm1, %v1521_v10  ;;  %v1150_v10 = vld [vmem:[%s1960_s5 + $0x10] sm:$0xff]  ;;  %s1523_s5 = smov [#allocation4]  }
 0x1ea   :  { %1410 = vmatmul.mubr.f32.vlgmr.msra.gmra.mxu0 %v1796_v29  ;;  %1445 = vmatmul.mubr.f32.vlgmr.msra.gmra.mxu1 %v1798_v30  ;;  %s1084_s23 = sshll.u32 %s1523_s5, 4  ;;  %s1085_s23 = int_to_ptr.vmem [resolvable:$true] %s1084_s23 }
 0x1eb   :  { %1454 = vmatprep.subr.mxu1 %v712_v61  ;;  %1447 = vmatprep.subr.mxu0 %v1151_v63  ;;  %s1477_s24 = scalar_lea.vmem %s1085_s23, 512  ;;  %p1482_p1 = scmp.lt.s32.totalorder %s1085_s23, %s1085_s23 }
 0x1ec   :  { %1455 = vmatpush3.msra.mxu1 %v712_v61  ;;  %1448 = vmatpush3.msra.mxu0 %v1151_v63  ;;  %p1478_p0 = scmp.ne.s32.totalorder %s1085_s23, %s1477_s24  ;;  %p1483_p2 = scmp.lt.s32.totalorder %s1477_s24, %s1477_s24 }
 0x1ed   :  { %1456 = vmatprep.subr.mxu1 %v711_v62  ;;  %1449 = vmatprep.subr.mxu0 %v1150_v10 }
 0x1ee   :  { %1457 = vmatpush3.msra.mxu1 %v711_v62  ;;  %1450 = vmatpush3.msra.mxu0 %v1150_v10  ;;  %p1484_p3 = por %p1483_p2, %p1482_p1 }
 0x1f0   :  { %p1485_p4 = pnand %p1484_p3, %p1478_p0 }
 0x289   :  { %v637_v0 = vpop.f32.mrf.mxu0  ;;  %v707_v1 = vpop.f32.mrf.mxu1 }
 0x28a   :  { %1458 = vmatprep.mubr.msk.f32.mxu1 %vm129_vm2, %v637_v0 }
 0x28b   :  { %v1341_v2 = vpop.f32.mrf.mxu0  ;;  %v1376_v3 = vpop.f32.mrf.mxu1  ;;  %1459 = vmatmul.mubr.msk.f32.vlgmr.msra.gmra.mxu1 %vm129_vm2, %v707_v1 }
 0x2aa   :  { %v817_v4 = vpop.f32.mrf.mxu0  ;;  %v887_v5 = vpop.f32.mrf.mxu1 }
 0x2ab   :  { %1451 = vmatprep.mubr.msk.f32.mxu0 %vm129_vm2, %v817_v4 }
 0x2ac   :  { %v1411_v6 = vpop.f32.mrf.mxu0  ;;  %v1446_v7 = vpop.f32.mrf.mxu1  ;;  %1452 = vmatmul.mubr.msk.f32.vlgmr.msra.gmra.mxu0 %vm129_vm2, %v887_v5 }
 0x2ad   :  { %1488 = shalt.err (!%p1485_p4)
}
 0x2ae   :  { %s1524_s25 = smov 128   ;;  %s1525_s26 = smov 8   ;;  %v1156_v11 = vld [vmem:[%s1961_s6] ss:$0 sm:$0xff] }
 0x2af   :  { %1090 = dma.vmem_to_hbm [thread:$0]  %s1085_s23, 512, %s1963_s8, [#allocation5], %s1524_s25, %s1524_s25, %s1525_s26  }
 0x2b0   :  { %s1526_s30 = smov [#allocation2]  }
 0x2b1   :  { %s1072_s9 = sshll.u32 %s1526_s30, 4  ;;  %s1073_s9 = int_to_ptr.vmem [resolvable:$true] %s1072_s9 }
 0x2b2   :  { %s1497_s8 = scalar_lea.vmem %s1073_s9, 256  ;;  %p1502_p6 = scmp.lt.s32.totalorder %s1073_s9, %s1073_s9 }
 0x2b3   :  { %p1498_p5 = scmp.ne.s32.totalorder %s1073_s9, %s1497_s8  ;;  %p1503_p7 = scmp.lt.s32.totalorder %s1497_s8, %s1497_s8 }
 0x2b5   :  { %p1504_p8 = por %p1503_p7, %p1502_p6 }
 0x2b7   :  { %p1505_p9 = pnand %p1504_p8, %p1498_p5 }
 0x34b   :  { %v1460_v8 = vpop.f32.mrf.mxu1 }
 0x34d   :  { %v1047_v13 = vpop.f32.mrf.mxu1 }
 0x36c   :  { %v1453_v9 = vpop.f32.mrf.mxu0 }
 0x36d   :  { %v1053_v12 = vadd.f32 %v1460_v8, %v1453_v9 }
 0x36e   :  { %v966_v14 = vpop.f32.mrf.mxu0 }
 0x36f   :  { %v1064_v15 = vadd.f32 %v1156_v11, %v1053_v12  ;;  %v1048_v16 = vadd.f32 %v1047_v13, %v966_v14 }
 0x371   :  { %1066 = vst.msk [vmem:[#allocation2 + $0x8] sm:$0xff] %vm43_vm0, %v1064_v15  ;;  %v1063_v17 = vadd.f32 %v1156_v11, %v1048_v16 }
 0x373   :  { %1065 = vst.msk [vmem:[#allocation2] sm:$0xff] %vm43_vm0, %v1063_v17 }
 0x374   :  { %1508 = shalt.err (!%p1505_p9)
}
 0x375   :  { %1078 = dma.vmem_to_hbm [thread:$0]  %s1073_s9, 256, %s1962_s7, [#allocation3], %s1524_s25, %s1524_s25, %s1525_s26  }
 0x376   :  { %1517 = dma.done.wait [#allocation3], 256  }
 0x377   :  { %1518 = vsyncadd [#allocation3], 4294967040 }
 0x378   :  { %1519 = dma.done.wait [#allocation5], 512  }
 0x379   :  { %1520 = vsyncadd [#allocation5], 4294966784 }
 0x37a   :  { %1097 = vsyncpa [#allocation3], 1 }
 0x37b   :  { %1098 = vsyncpa [#allocation5], 1 }

</bundles_post_ra>
